<compile_context>
chip_gen: v6e
topology: v6e:2x2x1
jax: 0.10.0
libtpu: 0.0.40
codegen_flags: <defaults>
</compile_context>

<pallas_src>
import functools

import jax
import jax.numpy as jnp
from jax.experimental import pallas as pl
from jax.experimental.pallas import tpu as pltpu


def _round_up(x, m):
    return (x + m - 1) // m * m


def _air_kernel(x_ref, wf_ref, wa_ref, o_ref):
    # x_ref:  (1, C_in, T)   channels on sublanes, pixels on lanes, f32 (cast in-kernel)
    # wf_ref: (C_in, BUF)    fused (backbone_1x1 @ random_buffer) weight, bf16
    # wa_ref: (BUF, N_CLS)   analytic (recursive) linear weight, bf16
    # o_ref:  (1, T, N_CLS)  pixel-major output block, bf16
    x = x_ref[0].astype(jnp.bfloat16)                  # (C_in, T) f32 -> bf16 (VPU, slack)
    x_t = x.T                                          # (T, C_in)  tiny XLU transpose
    h = jnp.dot(x_t, wf_ref[...],
                preferred_element_type=jnp.float32)    # (T, BUF), f32 accumulation
    h = jnp.maximum(h, 0.0).astype(jnp.bfloat16)       # ReLU of RandomBuffer
    y = jnp.dot(h, wa_ref[...],
                preferred_element_type=jnp.float32)    # (T, N_CLS), f32 accumulation
    o_ref[0] = y.astype(o_ref.dtype)


def prepare_air_weights(w_backbone, w_buffer, w_analytic):
    """One-time prep of the frozen weights (hoisted out of the per-call path).

    w_backbone: (C_in, backbone_output)   synthetic 1x1-conv backbone weight
    w_buffer:   (backbone_output, BUF)    frozen RandomBuffer weight (transposed Linear)
    w_analytic: (BUF, N_CLS)              analytic/recursive linear weight
    Returns (w_fused bf16 (C_in, BUF), w_analytic bf16 (BUF, N_CLS)).
    """
    w_fused = (w_backbone.astype(jnp.float32) @ w_buffer.astype(jnp.float32))
    return w_fused.astype(jnp.bfloat16), w_analytic.astype(jnp.bfloat16)


@functools.partial(jax.jit, static_argnames=("max_tile_hw",))
def air_forward(x_nchw, w_fused, w_analytic, *, max_tile_hw=4096):
    """x_nchw: (B, C_in, H, W) float32.  Returns (B, H*W, n_cls) bfloat16 (pixel-major)."""
    B, C_in, H, W = x_nchw.shape
    BUF = w_fused.shape[1]
    N_CLS = w_analytic.shape[1]
    HW = H * W

    # Adaptive lane-dense pixel tile: multiple of 128, no padding to a tile multiple
    # (Pallas masks the ragged last tile).  Force >= 2 grid steps for v7x's two TCs.
    n_tiles = max(1, pl.cdiv(HW, max_tile_hw))
    if B * n_tiles < 2:
        n_tiles = min(2, pl.cdiv(HW, 128))
    tile_hw = max(128, _round_up(pl.cdiv(HW, n_tiles), 128))
    n_tiles = pl.cdiv(HW, tile_hw)

    # NCHW -> (B, C_in, HW): contiguous, free reshape; no cast / pad copy in the wrapper.
    x_cn = x_nchw.reshape(B, C_in, HW)

    grid = (B, n_tiles)

    cost = pl.CostEstimate(
        flops=2 * B * HW * (C_in * BUF + BUF * N_CLS),
        transcendentals=0,
        bytes_accessed=(B * C_in * HW * 4            # f32 input
                        + B * HW * N_CLS * 2         # bf16 output
                        + (C_in * BUF + BUF * N_CLS) * 2),
    )

    out = pl.pallas_call(
        _air_kernel,
        out_shape=jax.ShapeDtypeStruct((B, HW, N_CLS), jnp.bfloat16),
        grid_spec=pltpu.PrefetchScalarGridSpec(
            num_scalar_prefetch=0,
            grid=grid,
            in_specs=[
                pl.BlockSpec((1, C_in, tile_hw), lambda b, j: (b, 0, j)),
                pl.BlockSpec((C_in, BUF), lambda b, j: (0, 0)),
                pl.BlockSpec((BUF, N_CLS), lambda b, j: (0, 0)),
            ],
            out_specs=pl.BlockSpec((1, tile_hw, N_CLS), lambda b, j: (b, j, 0)),
        ),
        compiler_params=pltpu.CompilerParams(
            # Fully parallel grid: both v7x TensorCores get work (grid has >= 2 steps).
            dimension_semantics=("parallel", "parallel"),
            vmem_limit_bytes=64 << 20,
        ),
        cost_estimate=cost,
    )(x_cn, w_fused, w_analytic)

    return out  # (B, H*W, n_cls) pixel-major, no wrapper transpose


if __name__ == "__main__":
    # Small shapes consistent with the module's forward.
    B, C_in, H, W = 2, 4, 16, 16        # input image-like tensor (NCHW)
    backbone_output = 32                # channels produced by the backbone
    buffer_size = 128                   # RandomBuffer expansion width
    n_classes = 16                      # columns of the analytic linear weight

    key = jax.random.PRNGKey(0)
    k_x, k_b, k_r, k_a = jax.random.split(key, 4)

    x = jax.random.normal(k_x, (B, C_in, H, W), dtype=jnp.float32)
    # Deterministic synthetic frozen parameters (shapes from __init__ semantics):
    w_backbone = jax.random.normal(k_b, (C_in, backbone_output), jnp.float32) * 0.1
    w_buffer = jax.random.normal(k_r, (backbone_output, buffer_size), jnp.float32) * 0.1
    w_analytic = jax.random.normal(k_a, (buffer_size, n_classes), jnp.float32) * 0.1

    # Frozen-weight prep runs once, outside the per-call path.
    w_fused_bf16, w_analytic_bf16 = prepare_air_weights(w_backbone, w_buffer, w_analytic)
    w_fused_bf16 = jax.block_until_ready(w_fused_bf16)

    y = air_forward(x, w_fused_bf16, w_analytic_bf16)
    y = jax.block_until_ready(y)
    assert y.shape == (B, H * W, n_classes)
    assert y.dtype == jnp.bfloat16

    y_f32 = y.astype(jnp.float32)

    # Reference 1: same bf16-operand / f32-accumulation math as the kernel
    # (tolerance accounts for the final bf16 rounding of the kernel output).
    N = B * H * W
    x_rows = jnp.transpose(x, (0, 2, 3, 1)).reshape(N, C_in)
    wf = w_backbone @ w_buffer
    h_b = jnp.maximum(
        jnp.dot(x_rows.astype(jnp.bfloat16), wf.astype(jnp.bfloat16),
                preferred_element_type=jnp.float32), 0.0)
    ref_b = jnp.dot(h_b.astype(jnp.bfloat16), w_analytic.astype(jnp.bfloat16),
                    preferred_element_type=jnp.float32).reshape(B, H * W, n_classes)
    assert jnp.allclose(y_f32, ref_b, atol=5e-3, rtol=5e-2)

    # Reference 2: full-f32, unfused two-matmul path (covers bf16 operand quantization
    # and the one extra rounding from pre-fusing the frozen weights).
    h_f = jnp.maximum(x_rows @ w_backbone @ w_buffer, 0.0)
    ref_f32 = (h_f @ w_analytic).reshape(B, H * W, n_classes)
    assert jnp.allclose(y_f32, ref_f32, atol=2e-2, rtol=2e-1)

    print("KERNEL_OK")
</pallas_src>

<mosaic_0001>
module attributes {stable_mosaic.version = 11 : i64} {
  func.func @_air_kernel(%arg0: i32, %arg1: i32, %arg2: memref<1x4x256xf32, #tpu.memory_space<vmem>>, %arg3: memref<4x128xbf16, #tpu.memory_space<vmem>>, %arg4: memref<128x16xbf16, #tpu.memory_space<vmem>>, %arg5: memref<1x256x16xbf16, #tpu.memory_space<vmem>>) attributes {dimension_semantics = [#tpu.dimension_semantics<parallel>, #tpu.dimension_semantics<parallel>], iteration_bounds = array<i64: 2, 1>, scalar_prefetch = 0 : i64, scratch_operands = 0 : i64, tpu.core_type = #tpu.core_type<tc>, window_params = [{transform_indices = @transform_0, window_bounds = array<i64: 1, 4, 256>}, {pipeline_mode = #tpu.pipeline_mode<synchronous>, transform_indices = @transform_1, window_bounds = array<i64: 4, 128>}, {pipeline_mode = #tpu.pipeline_mode<synchronous>, transform_indices = @transform_2, window_bounds = array<i64: 128, 16>}, {transform_indices = @transform_3, window_bounds = array<i64: 1, 256, 16>}]} {
    %c0 = arith.constant 0 : index
    %c0_0 = arith.constant 0 : index
    %c0_1 = arith.constant 0 : index
    %0 = vector.load %arg2[%c0, %c0_0, %c0_1] : memref<1x4x256xf32, #tpu.memory_space<vmem>>, vector<1x4x256xf32>
    %1 = vector.shape_cast %0 : vector<1x4x256xf32> to vector<4x256xf32>
    %2 = arith.truncf %1 : vector<4x256xf32> to vector<4x256xbf16>
    %3 = tpu.transpose %2, [1, 0] : vector<4x256xbf16> -> vector<256x4xbf16>
    %c0_2 = arith.constant 0 : index
    %c0_3 = arith.constant 0 : index
    %4 = vector.load %arg3[%c0_2, %c0_3] : memref<4x128xbf16, #tpu.memory_space<vmem>>, vector<4x128xbf16>
    %cst = arith.constant dense<0.000000e+00> : vector<256x128xf32>
    %5 = tpu.matmul %3, %4, %cst {dimension_numbers = #tpu.dot_dimension_numbers<[1], [0], [0], [1], [0, 0, 1, 1], [], []>} : vector<256x4xbf16>, vector<4x128xbf16>, vector<256x128xf32> -> vector<256x128xf32>
    %cst_4 = arith.constant 0.000000e+00 : f32
    %6 = vector.broadcast %cst_4 : f32 to vector<256x128xf32>
    %7 = arith.maximumf %5, %6 : vector<256x128xf32>
    %8 = arith.truncf %7 : vector<256x128xf32> to vector<256x128xbf16>
    %c0_5 = arith.constant 0 : index
    %c0_6 = arith.constant 0 : index
    %9 = vector.load %arg4[%c0_5, %c0_6] : memref<128x16xbf16, #tpu.memory_space<vmem>>, vector<128x16xbf16>
    %cst_7 = arith.constant dense<0.000000e+00> : vector<256x16xf32>
    %10 = tpu.matmul %8, %9, %cst_7 {dimension_numbers = #tpu.dot_dimension_numbers<[1], [0], [0], [1], [0, 0, 1, 1], [], []>} : vector<256x128xbf16>, vector<128x16xbf16>, vector<256x16xf32> -> vector<256x16xf32>
    %11 = arith.truncf %10 : vector<256x16xf32> to vector<256x16xbf16>
    %c0_8 = arith.constant 0 : index
    %c0_9 = arith.constant 0 : index
    %c0_10 = arith.constant 0 : index
    %12 = vector.load %arg5[%c0_8, %c0_9, %c0_10] : memref<1x256x16xbf16, #tpu.memory_space<vmem>>, vector<1x256x16xbf16>
    %13 = vector.shape_cast %12 : vector<1x256x16xbf16> to vector<256x16xbf16>
    %14 = vector.shape_cast %11 : vector<256x16xbf16> to vector<1x256x16xbf16>
    tpu.vector_store %arg5[%c0_8, %c0_9, %c0_10], %14 {strides = array<i32>} : memref<1x256x16xbf16, #tpu.memory_space<vmem>>, vector<1x256x16xbf16>,
    return
  }
  func.func @transform_0(%arg0: i32, %arg1: i32) -> (i32, i32, i32) {
    %c0_i32 = arith.constant 0 : i32
    %c0_i32_0 = arith.constant 0 : i32
    return %arg0, %c0_i32, %arg1 : i32, i32, i32
  }
  func.func @transform_1(%arg0: i32, %arg1: i32) -> (i32, i32) {
    %c0_i32 = arith.constant 0 : i32
    %c0_i32_0 = arith.constant 0 : i32
    %c0_i32_1 = arith.constant 0 : i32
    return %c0_i32, %c0_i32_0 : i32, i32
  }
  func.func @transform_2(%arg0: i32, %arg1: i32) -> (i32, i32) {
    %c0_i32 = arith.constant 0 : i32
    %c0_i32_0 = arith.constant 0 : i32
    %c0_i32_1 = arith.constant 0 : i32
    return %c0_i32, %c0_i32_0 : i32, i32
  }
  func.func @transform_3(%arg0: i32, %arg1: i32) -> (i32, i32, i32) {
    %c0_i32 = arith.constant 0 : i32
    %c0_i32_0 = arith.constant 0 : i32
    return %arg0, %arg1, %c0_i32 : i32, i32, i32
  }
}

</mosaic_0001>

<bundles_post_ra>
// kernel: air_forward.1
= control target key start
LH: loop header
LB: loop body
LE: loop exit
PB: predicated region body
PF: predicated region fallthrough
CT: control target
= control target key end

     0   :  { %s1304_s12 = smov 0   ;;  %s1306_s13 = smov 0   ;;  %s1450_s0 = inlined_call_operand.vmem [shape: f32[2,4,256], index: 0, kind: input, shape index: {}]   ;;  %s1451_s1 = inlined_call_operand.vmem [shape: bf16[4,128], index: 1, kind: input, shape index: {}]   ;;  %s1452_s2 = inlined_call_operand.vmem [shape: bf16[128,16], index: 2, kind: input, shape index: {}]   ;;  %s1453_s3 = inlined_call_operand.vmem [shape: bf16[2,256,16], index: 3, kind: output, shape index: {}]  }
   0x1   :  { %s1308_s14 = smov 0  }
   0x2 LB: > { %s25_s15 = sadd.s32 1, %s1278_s13  ;;  %p989_p0 = scmp.ge.s32.totalorder %s1282_s14, 1  ;;  %s1282_s14 = sphi %s1308_s14, %s13_s14   ;;  %s1278_s13 = sphi %s1306_s13, %s1455_s13   ;;  %s1274_s12 = sphi %s1304_s12, %s1454_s12  }
   0x3   : > { %p27_p1 = scmp.ge.s32.totalorder %s25_s15, 2  ;;  %p158_p2 = scmp.lt.s32.totalorder %s1282_s14, 3 }
   0x5   : > { %s1457_s15 = smov (%p27_p1, %s25_s15), 0  ;;  %p159_p3 = pnand %p989_p0, %p158_p2 }
   0x6   : > { %p191_p4 = scmp.lt.s32.totalorder (!%p159_p3), %s1274_s12, 1 }
   0x7   : > { %162 = sbr.rel (%p159_p3) target bundleno = 583 (0x247), region = 32 }
   0xc   : > { %v249_v0 = vld [vmem:[%s1451_s1] sm:$0x3]  ;;  %vm299_vm0 = vcmask 1041408   ;;  %s1459_s12 = smov (!%p191_p4, %s1274_s12), 1  ;;  %v1252_v6 = vld [vmem:[%s1452_s2 + $0x38] sm:$0xff]   ;;  %v1253_v7 = vld [vmem:[%s1452_s2 + $0x30] sm:$0xff]  }
   0xd   : > { %1225 = vmatprep.subr.msk.bf16.mxu0 %vm299_vm0, %v249_v0  ;;  %v301_v1 = vsel %vm299_vm0, %v249_v0, 0  ;;  %s1052_s18 = sshll.u32 %s1459_s12, 3  ;;  %1209 = vmatprep.subr.bf16.mxu1 %v1252_v6  ;;  %v1254_v8 = vld [vmem:[%s1452_s2 + $0x28] sm:$0xff]   ;;  %v1255_v9 = vld [vmem:[%s1452_s2 + $0x20] sm:$0xff]   ;;  %v1256_v10 = vld [vmem:[%s1452_s2 + $0x18] sm:$0xff]   ;;  %vm250_vm1 = vcmask 31744  }
   0xe   : > { %1128 = vmatpush3.bf16.msra.mxu0 %v301_v1  ;;  %s198_s21 = scalar_lea.vmem %s1450_s0, %s1052_s18  ;;  %1217 = vmatpush3.bf16.msra.mxu1 %v1252_v6  ;;  %v1257_v27 = vld [vmem:[%s1452_s2 + $0x10] sm:$0xff]   ;;  %v1258_v28 = vld [vmem:[%s1452_s2 + $0x8] sm:$0xff]   ;;  %v1259_v29 = vld [vmem:[%s1452_s2] sm:$0xff]   ;;  %s1053_s11 = sshll.u32 %s1459_s12, 7  ;;  %vm865_vm2 = vcmask 125952  }
   0xf   : > { %v211_v2 = vld [vmem:[%s198_s21] sm:$0xff]  ;;  %1161 = vmatprep.subr.bf16.mxu0 %v1252_v6  ;;  %1210 = vmatprep.subr.bf16.mxu1 %v1253_v7  ;;  %s1375_s18 = scalar_lea.vmem %s1453_s3, %s1053_s11 }
  0x10   : > { %v215_v3 = vpack.c.bf16 %v211_v2, %v211_v2  ;;  %v213_v4 = vcombine.high %v211_v2, %v211_v2 }
  0x12   : > { %217 = vxpose.xlu0.c.b16.start.end [1/1] (short) %v215_v3, 128  ;;  %v216_v5 = vpack.c.bf16 %v213_v4, %v213_v4  ;;  %1218 = vmatpush3.bf16.msra.mxu1 %v1253_v7 }
  0x13   : > { %1211 = vmatprep.subr.bf16.mxu1 %v1254_v8 }
  0x16   : > { %1219 = vmatpush3.bf16.msra.mxu1 %v1254_v8 }
  0x17   : > { %1212 = vmatprep.subr.bf16.mxu1 %v1255_v9 }
  0x1a   : > { %1220 = vmatpush3.bf16.msra.mxu1 %v1255_v9 }
  0x1b   : > { %1213 = vmatprep.subr.bf16.mxu1 %v1256_v10 }
  0x1e   : > { %1221 = vmatpush3.bf16.msra.mxu1 %v1256_v10 }
  0x1f   : > { %1214 = vmatprep.subr.bf16.mxu1 %v1257_v27 }
  0x22   : > { %1222 = vmatpush3.bf16.msra.mxu1 %v1257_v27 }
  0x23   : > { %1215 = vmatprep.subr.bf16.mxu1 %v1258_v28 }
  0x26   : > { %1223 = vmatpush3.bf16.msra.mxu1 %v1258_v28 }
  0x27   : > { %1216 = vmatprep.subr.bf16.mxu1 %v1259_v29 }
  0x2a   : > { %1224 = vmatpush3.bf16.msra.mxu1 %v1259_v29 }
  0x2f   : > { %233 = vxpose.xlu0.c.b16.start.end [1/1] (short) %v216_v5, 128 }
  0x74   : > { %v225_v11 = vpop.trf.xlu0 }
  0x75   : > { %1129 = vmatprep.mubr.msk.bf16.mxu0 %vm250_vm1, %v225_v11 }
  0x78   : > { %v226_v12 = vpop.trf.xlu0 }
  0x79   : > { %1130 = vmatmul.mubr.msk.bf16.vlgmr.msra.gmra.mxu0 %vm250_vm1, %v226_v12 }
  0x7a   : > { %1162 = vmatpush3.bf16.msra.mxu0 %v1252_v6 }
  0x7b   : > { %1163 = vmatprep.subr.bf16.mxu0 %v1253_v7 }
  0x7c   : > { %v227_v13 = vpop.trf.xlu0 }
  0x7d   : > { %1133 = vmatprep.mubr.msk.bf16.mxu0 %vm250_vm1, %v227_v13 }
  0x7e   : > { %1164 = vmatpush3.bf16.msra.mxu0 %v1253_v7 }
  0x7f   : > { %1165 = vmatprep.subr.bf16.mxu0 %v1254_v8 }
  0x80   : > { %v228_v14 = vpop.trf.xlu0 }
  0x81   : > { %1134 = vmatmul.mubr.msk.bf16.gmra.mxu0 %vm250_vm1, %v228_v14 }
  0x82   : > { %1166 = vmatpush3.bf16.msra.mxu0 %v1254_v8 }
  0x83   : > { %1167 = vmatprep.subr.bf16.mxu0 %v1255_v9 }
  0x84   : > { %v229_v15 = vpop.trf.xlu0 }
  0x85   : > { %1137 = vmatprep.mubr.msk.bf16.mxu0 %vm250_vm1, %v229_v15 }
  0x86   : > { %1168 = vmatpush3.bf16.msra.mxu0 %v1255_v9 }
  0x87   : > { %1169 = vmatprep.subr.bf16.mxu0 %v1256_v10 }
  0x88   : > { %v230_v16 = vpop.trf.xlu0 }
  0x89   : > { %1138 = vmatmul.mubr.msk.bf16.gmra.mxu0 %vm250_vm1, %v230_v16 }
  0x8a   : > { %1170 = vmatpush3.bf16.msra.mxu0 %v1256_v10 }
  0x8b   : > { %1171 = vmatprep.subr.bf16.mxu0 %v1257_v27 }
  0x8c   : > { %v231_v17 = vpop.trf.xlu0 }
  0x8d   : > { %1141 = vmatprep.mubr.msk.bf16.mxu0 %vm250_vm1, %v231_v17 }
  0x8e   : > { %1172 = vmatpush3.bf16.msra.mxu0 %v1257_v27 }
  0x8f   : > { %1173 = vmatprep.subr.bf16.mxu0 %v1258_v28 }
  0x90   : > { %v232_v18 = vpop.trf.xlu0 }
  0x91   : > { %1142 = vmatmul.mubr.msk.bf16.gmra.mxu0 %vm250_vm1, %v232_v18 }
  0x92   : > { %1174 = vmatpush3.bf16.msra.mxu0 %v1258_v28 }
  0x93   : > { %1175 = vmatprep.subr.bf16.mxu0 %v1259_v29 }
  0x94   : > { %v241_v19 = vpop.trf.xlu0 }
  0x95   : > { %1145 = vmatprep.mubr.msk.bf16.mxu0 %vm250_vm1, %v241_v19 }
  0x96   : > { %1176 = vmatpush3.bf16.msra.mxu0 %v1259_v29 }
  0x98   : > { %v242_v20 = vpop.trf.xlu0 }
  0x99   : > { %1146 = vmatmul.mubr.msk.bf16.gmra.mxu0 %vm250_vm1, %v242_v20 }
  0x9c   : > { %v243_v21 = vpop.trf.xlu0 }
  0x9d   : > { %1149 = vmatprep.mubr.msk.bf16.mxu0 %vm250_vm1, %v243_v21 }
  0xa0   : > { %v244_v22 = vpop.trf.xlu0 }
  0xa1   : > { %1150 = vmatmul.mubr.msk.bf16.gmra.mxu0 %vm250_vm1, %v244_v22 }
  0xa4   : > { %v245_v23 = vpop.trf.xlu0 }
  0xa5   : > { %1153 = vmatprep.mubr.msk.bf16.mxu0 %vm250_vm1, %v245_v23 }
  0xa8   : > { %v246_v24 = vpop.trf.xlu0 }
  0xa9   : > { %1154 = vmatmul.mubr.msk.bf16.gmra.mxu0 %vm250_vm1, %v246_v24 }
  0xac   : > { %v247_v25 = vpop.trf.xlu0 }
  0xad   : > { %1157 = vmatprep.mubr.msk.bf16.mxu0 %vm250_vm1, %v247_v25 }
  0xb0   : > { %v248_v26 = vpop.trf.xlu0 }
  0xb1   : > { %1158 = vmatmul.mubr.msk.bf16.gmra.mxu0 %vm250_vm1, %v248_v26 }
 0x139   : > { %v1131_v30 = vpop.f32.mrf.mxu0 }
 0x13a   : > { %v466_v37 = vmax.f32 %v1131_v30, 0.0 }
 0x13b   : > { %v337_v31 = vpop.f32.mrf.mxu0 }
 0x13c   : > { %v464_v35 = vmax.f32 %v337_v31, 0.0 }
 0x13d   : > { %v1132_v32 = vpop.f32.mrf.mxu0 }
 0x13e   : > { %v467_v33 = vmax.f32 %v1132_v32, 0.0 }
 0x13f   : > { %v340_v34 = vpop.f32.mrf.mxu0 }
 0x140   : > { %v465_v36 = vmax.f32 %v340_v34, 0.0  ;;  %v497_v40 = vpack.c.bf16 %v467_v33, %v466_v37 }
 0x141   : > { %v1135_v38 = vpop.f32.mrf.mxu0 }
 0x142   : > { %v496_v39 = vpack.c.bf16 %v465_v36, %v464_v35  ;;  %v470_v47 = vmax.f32 %v1135_v38, 0.0 }
 0x143   : > { %v353_v41 = vpop.f32.mrf.mxu0 }
 0x144   : > { %1177 = vmatprep.mubr.bf16.mxu0 %v496_v39  ;;  %v468_v45 = vmax.f32 %v353_v41, 0.0 }
 0x145   : > { %v1136_v42 = vpop.f32.mrf.mxu0  ;;  %1178 = vmatmul.mubr.bf16.vlgmr.msra.gmra.mxu0 %v497_v40 }
 0x146   : > { %v471_v43 = vmax.f32 %v1136_v42, 0.0 }
 0x147   : > { %v356_v44 = vpop.f32.mrf.mxu0 }
 0x148   : > { %v469_v46 = vmax.f32 %v356_v44, 0.0  ;;  %v499_v50 = vpack.c.bf16 %v471_v43, %v470_v47 }
 0x149   : > { %v1139_v48 = vpop.f32.mrf.mxu0 }
 0x14a   : > { %v498_v49 = vpack.c.bf16 %v469_v46, %v468_v45  ;;  %v474_v57 = vmax.f32 %v1139_v48, 0.0 }
 0x14b   : > { %v369_v51 = vpop.f32.mrf.mxu0 }
 0x14c   : > { %1181 = vmatprep.mubr.bf16.mxu1 %v498_v49  ;;  %v472_v55 = vmax.f32 %v369_v51, 0.0 }
 0x14d   : > { %v1140_v52 = vpop.f32.mrf.mxu0  ;;  %1182 = vmatmul.mubr.bf16.vlgmr.msra.gmra.mxu1 %v499_v50 }
 0x14e   : > { %v475_v53 = vmax.f32 %v1140_v52, 0.0 }
 0x14f   : > { %v372_v54 = vpop.f32.mrf.mxu0 }
 0x150   : > { %v473_v56 = vmax.f32 %v372_v54, 0.0  ;;  %v501_v60 = vpack.c.bf16 %v475_v53, %v474_v57 }
 0x151   : > { %v1143_v58 = vpop.f32.mrf.mxu0 }
 0x152   : > { %v500_v59 = vpack.c.bf16 %v473_v56, %v472_v55  ;;  %v478_v3 = vmax.f32 %v1143_v58, 0.0 }
 0x153   : > { %v385_v61 = vpop.f32.mrf.mxu0 }
 0x154   : > { %1185 = vmatprep.mubr.bf16.mxu1 %v500_v59  ;;  %v476_v1 = vmax.f32 %v385_v61, 0.0 }
 0x155   : > { %v1144_v62 = vpop.f32.mrf.mxu0  ;;  %1186 = vmatmul.mubr.bf16.gmra.mxu1 %v501_v60 }
 0x156   : > { %v479_v63 = vmax.f32 %v1144_v62, 0.0 }
 0x157   : > { %v388_v0 = vpop.f32.mrf.mxu0 }
 0x158   : > { %v477_v2 = vmax.f32 %v388_v0, 0.0  ;;  %v503_v6 = vpack.c.bf16 %v479_v63, %v478_v3 }
 0x159   : > { %v1147_v4 = vpop.f32.mrf.mxu0 }
 0x15a   : > { %v502_v5 = vpack.c.bf16 %v477_v2, %v476_v1  ;;  %v482_v13 = vmax.f32 %v1147_v4, 0.0 }
 0x15b   : > { %v401_v7 = vpop.f32.mrf.mxu0 }
 0x15c   : > { %1189 = vmatprep.mubr.bf16.mxu1 %v502_v5  ;;  %v480_v11 = vmax.f32 %v401_v7, 0.0 }
 0x15d   : > { %v1148_v8 = vpop.f32.mrf.mxu0  ;;  %1190 = vmatmul.mubr.bf16.gmra.mxu1 %v503_v6 }
 0x15e   : > { %v483_v9 = vmax.f32 %v1148_v8, 0.0 }
 0x15f   : > { %v404_v10 = vpop.f32.mrf.mxu0 }
 0x160   : > { %v481_v12 = vmax.f32 %v404_v10, 0.0  ;;  %v505_v16 = vpack.c.bf16 %v483_v9, %v482_v13 }
 0x161   : > { %v1151_v14 = vpop.f32.mrf.mxu0 }
 0x162   : > { %v504_v15 = vpack.c.bf16 %v481_v12, %v480_v11  ;;  %v486_v23 = vmax.f32 %v1151_v14, 0.0 }
 0x163   : > { %v417_v17 = vpop.f32.mrf.mxu0 }
 0x164   : > { %1193 = vmatprep.mubr.bf16.mxu1 %v504_v15  ;;  %v484_v21 = vmax.f32 %v417_v17, 0.0 }
 0x165   : > { %v1152_v18 = vpop.f32.mrf.mxu0  ;;  %1194 = vmatmul.mubr.bf16.gmra.mxu1 %v505_v16 }
 0x166   : > { %v487_v19 = vmax.f32 %v1152_v18, 0.0 }
 0x167   : > { %v420_v20 = vpop.f32.mrf.mxu0 }
 0x168   : > { %v485_v22 = vmax.f32 %v420_v20, 0.0  ;;  %v507_v26 = vpack.c.bf16 %v487_v19, %v486_v23 }
 0x169   : > { %v1155_v24 = vpop.f32.mrf.mxu0 }
 0x16a   : > { %v506_v25 = vpack.c.bf16 %v485_v22, %v484_v21  ;;  %v490_v33 = vmax.f32 %v1155_v24, 0.0 }
 0x16b   : > { %v433_v27 = vpop.f32.mrf.mxu0 }
 0x16c   : > { %1197 = vmatprep.mubr.bf16.mxu1 %v506_v25  ;;  %v488_v31 = vmax.f32 %v433_v27, 0.0 }
 0x16d   : > { %v1156_v28 = vpop.f32.mrf.mxu0  ;;  %1198 = vmatmul.mubr.bf16.gmra.mxu1 %v507_v26 }
 0x16e   : > { %v491_v29 = vmax.f32 %v1156_v28, 0.0 }
 0x16f   : > { %v436_v30 = vpop.f32.mrf.mxu0 }
 0x170   : > { %v489_v32 = vmax.f32 %v436_v30, 0.0  ;;  %v509_v36 = vpack.c.bf16 %v491_v29, %v490_v33 }
 0x171   : > { %v1159_v34 = vpop.f32.mrf.mxu0 }
 0x172   : > { %v508_v35 = vpack.c.bf16 %v489_v32, %v488_v31  ;;  %v494_v43 = vmax.f32 %v1159_v34, 0.0 }
 0x173   : > { %v449_v37 = vpop.f32.mrf.mxu0 }
 0x174   : > { %1201 = vmatprep.mubr.bf16.mxu1 %v508_v35  ;;  %v492_v41 = vmax.f32 %v449_v37, 0.0 }
 0x175   : > { %v1160_v38 = vpop.f32.mrf.mxu0  ;;  %1202 = vmatmul.mubr.bf16.gmra.mxu1 %v509_v36 }
 0x176   : > { %v495_v39 = vmax.f32 %v1160_v38, 0.0 }
 0x177   : > { %v452_v40 = vpop.f32.mrf.mxu0 }
 0x178   : > { %v493_v42 = vmax.f32 %v452_v40, 0.0  ;;  %v511_v45 = vpack.c.bf16 %v495_v39, %v494_v43 }
 0x17a   : > { %v510_v44 = vpack.c.bf16 %v493_v42, %v492_v41 }
 0x17c   : > { %1205 = vmatprep.mubr.bf16.mxu1 %v510_v44 }
 0x17d   : > { %1206 = vmatmul.mubr.bf16.gmra.mxu1 %v511_v45 }
 0x205   : > { %v1179_v46 = vpop.f32.mrf.mxu0 }
 0x206   : > { %v1056_v47 = vpack.c.bf16 %v1179_v46, %v1179_v46 }
 0x207   : > { %v610_v48 = vpop.f32.mrf.mxu0 }
 0x208   : > { %868 = vst.msk [vmem:[%s1375_s18 + $0x8] sm:$0xf] %vm865_vm2, %v1056_v47  ;;  %v1054_v49 = vpack.c.bf16 %v610_v48, %v610_v48 }
 0x209   : > { %v1180_v50 = vpop.f32.mrf.mxu0 }
 0x20a   : > { %866 = vst.msk [vmem:[%s1375_s18] sm:$0xf] %vm865_vm2, %v1054_v49  ;;  %v1057_v51 = vpack.c.bf16 %v1180_v50, %v1180_v50 }
 0x20b   : > { %v613_v52 = vpop.f32.mrf.mxu0 }
 0x20c   : > { %869 = vst.msk [vmem:[%s1375_s18 + $0xc] sm:$0xf] %vm865_vm2, %v1057_v51  ;;  %v1055_v53 = vpack.c.bf16 %v613_v52, %v613_v52 }
 0x20d   : > { %v1183_v54 = vpop.f32.mrf.mxu1 }
 0x20e   : > { %867 = vst.msk [vmem:[%s1375_s18 + $0x4] sm:$0xf] %vm865_vm2, %v1055_v53  ;;  %v1060_v55 = vpack.c.bf16 %v1183_v54, %v1183_v54 }
 0x20f   : > { %v626_v56 = vpop.f32.mrf.mxu1 }
 0x210   : > { %872 = vst.msk [vmem:[%s1375_s18 + $0x18] sm:$0xf] %vm865_vm2, %v1060_v55  ;;  %v1058_v57 = vpack.c.bf16 %v626_v56, %v626_v56 }
 0x211   : > { %v1184_v58 = vpop.f32.mrf.mxu1 }
 0x212   : > { %870 = vst.msk [vmem:[%s1375_s18 + $0x10] sm:$0xf] %vm865_vm2, %v1058_v57  ;;  %v1061_v59 = vpack.c.bf16 %v1184_v58, %v1184_v58 }
 0x213   : > { %v629_v60 = vpop.f32.mrf.mxu1 }
 0x214   : > { %873 = vst.msk [vmem:[%s1375_s18 + $0x1c] sm:$0xf] %vm865_vm2, %v1061_v59  ;;  %v1059_v61 = vpack.c.bf16 %v629_v60, %v629_v60 }
 0x215   : > { %v1187_v62 = vpop.f32.mrf.mxu1 }
 0x216   : > { %871 = vst.msk [vmem:[%s1375_s18 + $0x14] sm:$0xf] %vm865_vm2, %v1059_v61  ;;  %v1064_v63 = vpack.c.bf16 %v1187_v62, %v1187_v62 }
 0x217   : > { %v642_v0 = vpop.f32.mrf.mxu1 }
 0x218   : > { %876 = vst.msk [vmem:[%s1375_s18 + $0x28] sm:$0xf] %vm865_vm2, %v1064_v63  ;;  %v1062_v1 = vpack.c.bf16 %v642_v0, %v642_v0 }
 0x219   : > { %v1188_v2 = vpop.f32.mrf.mxu1 }
 0x21a   : > { %874 = vst.msk [vmem:[%s1375_s18 + $0x20] sm:$0xf] %vm865_vm2, %v1062_v1  ;;  %v1065_v3 = vpack.c.bf16 %v1188_v2, %v1188_v2 }
 0x21b   : > { %v645_v4 = vpop.f32.mrf.mxu1 }
 0x21c   : > { %877 = vst.msk [vmem:[%s1375_s18 + $0x2c] sm:$0xf] %vm865_vm2, %v1065_v3  ;;  %v1063_v5 = vpack.c.bf16 %v645_v4, %v645_v4 }
 0x21d   : > { %v1191_v6 = vpop.f32.mrf.mxu1 }
 0x21e   : > { %875 = vst.msk [vmem:[%s1375_s18 + $0x24] sm:$0xf] %vm865_vm2, %v1063_v5  ;;  %v1068_v7 = vpack.c.bf16 %v1191_v6, %v1191_v6 }
 0x21f   : > { %v658_v8 = vpop.f32.mrf.mxu1 }
 0x220   : > { %880 = vst.msk [vmem:[%s1375_s18 + $0x38] sm:$0xf] %vm865_vm2, %v1068_v7  ;;  %v1066_v9 = vpack.c.bf16 %v658_v8, %v658_v8 }
 0x221   : > { %v1192_v10 = vpop.f32.mrf.mxu1 }
 0x222   : > { %878 = vst.msk [vmem:[%s1375_s18 + $0x30] sm:$0xf] %vm865_vm2, %v1066_v9  ;;  %v1069_v11 = vpack.c.bf16 %v1192_v10, %v1192_v10 }
 0x223   : > { %v661_v12 = vpop.f32.mrf.mxu1 }
 0x224   : > { %881 = vst.msk [vmem:[%s1375_s18 + $0x3c] sm:$0xf] %vm865_vm2, %v1069_v11  ;;  %v1067_v13 = vpack.c.bf16 %v661_v12, %v661_v12 }
 0x225   : > { %v1195_v14 = vpop.f32.mrf.mxu1 }
 0x226   : > { %879 = vst.msk [vmem:[%s1375_s18 + $0x34] sm:$0xf] %vm865_vm2, %v1067_v13  ;;  %v1072_v15 = vpack.c.bf16 %v1195_v14, %v1195_v14 }
 0x227   : > { %v674_v16 = vpop.f32.mrf.mxu1 }
 0x228   : > { %884 = vst.msk [vmem:[%s1375_s18 + $0x48] sm:$0xf] %vm865_vm2, %v1072_v15  ;;  %v1070_v17 = vpack.c.bf16 %v674_v16, %v674_v16 }
 0x229   : > { %v1196_v18 = vpop.f32.mrf.mxu1 }
 0x22a   : > { %882 = vst.msk [vmem:[%s1375_s18 + $0x40] sm:$0xf] %vm865_vm2, %v1070_v17  ;;  %v1073_v19 = vpack.c.bf16 %v1196_v18, %v1196_v18 }
 0x22b   : > { %v677_v20 = vpop.f32.mrf.mxu1 }
 0x22c   : > { %885 = vst.msk [vmem:[%s1375_s18 + $0x4c] sm:$0xf] %vm865_vm2, %v1073_v19  ;;  %v1071_v21 = vpack.c.bf16 %v677_v20, %v677_v20 }
 0x22d   : > { %v1199_v22 = vpop.f32.mrf.mxu1 }
 0x22e   : > { %883 = vst.msk [vmem:[%s1375_s18 + $0x44] sm:$0xf] %vm865_vm2, %v1071_v21  ;;  %v1076_v23 = vpack.c.bf16 %v1199_v22, %v1199_v22 }
 0x22f   : > { %v690_v24 = vpop.f32.mrf.mxu1 }
 0x230   : > { %888 = vst.msk [vmem:[%s1375_s18 + $0x58] sm:$0xf] %vm865_vm2, %v1076_v23  ;;  %v1074_v25 = vpack.c.bf16 %v690_v24, %v690_v24 }
 0x231   : > { %v1200_v26 = vpop.f32.mrf.mxu1 }
 0x232   : > { %886 = vst.msk [vmem:[%s1375_s18 + $0x50] sm:$0xf] %vm865_vm2, %v1074_v25  ;;  %v1077_v27 = vpack.c.bf16 %v1200_v26, %v1200_v26 }
 0x233   : > { %v693_v28 = vpop.f32.mrf.mxu1 }
 0x234   : > { %889 = vst.msk [vmem:[%s1375_s18 + $0x5c] sm:$0xf] %vm865_vm2, %v1077_v27  ;;  %v1075_v29 = vpack.c.bf16 %v693_v28, %v693_v28 }
 0x235   : > { %v1203_v30 = vpop.f32.mrf.mxu1 }
 0x236   : > { %887 = vst.msk [vmem:[%s1375_s18 + $0x54] sm:$0xf] %vm865_vm2, %v1075_v29  ;;  %v1080_v31 = vpack.c.bf16 %v1203_v30, %v1203_v30 }
 0x237   : > { %v706_v32 = vpop.f32.mrf.mxu1 }
 0x238   : > { %892 = vst.msk [vmem:[%s1375_s18 + $0x68] sm:$0xf] %vm865_vm2, %v1080_v31  ;;  %v1078_v33 = vpack.c.bf16 %v706_v32, %v706_v32 }
 0x239   : > { %v1204_v34 = vpop.f32.mrf.mxu1 }
 0x23a   : > { %890 = vst.msk [vmem:[%s1375_s18 + $0x60] sm:$0xf] %vm865_vm2, %v1078_v33  ;;  %v1081_v35 = vpack.c.bf16 %v1204_v34, %v1204_v34 }
 0x23b   : > { %v709_v36 = vpop.f32.mrf.mxu1 }
 0x23c   : > { %893 = vst.msk [vmem:[%s1375_s18 + $0x6c] sm:$0xf] %vm865_vm2, %v1081_v35  ;;  %v1079_v37 = vpack.c.bf16 %v709_v36, %v709_v36 }
 0x23d   : > { %v1207_v38 = vpop.f32.mrf.mxu1 }
 0x23e   : > { %891 = vst.msk [vmem:[%s1375_s18 + $0x64] sm:$0xf] %vm865_vm2, %v1079_v37  ;;  %v1084_v39 = vpack.c.bf16 %v1207_v38, %v1207_v38 }
 0x23f   : > { %v722_v40 = vpop.f32.mrf.mxu1 }
 0x240   : > { %896 = vst.msk [vmem:[%s1375_s18 + $0x78] sm:$0xf] %vm865_vm2, %v1084_v39  ;;  %v1082_v41 = vpack.c.bf16 %v722_v40, %v722_v40 }
 0x241   : > { %v1208_v42 = vpop.f32.mrf.mxu1 }
 0x242   : > { %894 = vst.msk [vmem:[%s1375_s18 + $0x70] sm:$0xf] %vm865_vm2, %v1082_v41  ;;  %v1085_v43 = vpack.c.bf16 %v1208_v42, %v1208_v42 }
 0x243   : > { %v725_v44 = vpop.f32.mrf.mxu1 }
 0x244   : > { %897 = vst.msk [vmem:[%s1375_s18 + $0x7c] sm:$0xf] %vm865_vm2, %v1085_v43  ;;  %v1083_v45 = vpack.c.bf16 %v725_v44, %v725_v44 }
 0x246   : > { %895 = vst.msk [vmem:[%s1375_s18 + $0x74] sm:$0xf] %vm865_vm2, %v1083_v45 }
 0x247 PF: > { %s13_s14 = sadd.s32 1, %s1282_s14   ;;  %s1454_s12 = smov %s1278_s13 }
 0x248   : > { %p10_p5 = scmp.ge.s32.totalorder %s13_s14, 4   ;;  %s1455_s13 = smov %s1457_s15 }
 0x24a   :  { %12 = sbr.rel (!%p10_p5) target bundleno = 2 (0x2), region = 62 }

</bundles_post_ra>
